<compile_context>
chip_gen: v7x
topology: tpu7x:2x2x1
jax: 0.10.0
libtpu: 0.0.40
codegen_flags: <defaults>
</compile_context>

<pallas_src>
import math

import jax
import jax.numpy as jnp
from jax.experimental import pallas as pl
from jax.experimental.pallas import tpu as pltpu


# ---------------------------------------------------------------------------
# Kernels
# ---------------------------------------------------------------------------

def _drop_path_kernel(mask_ref, x_ref, o_ref):
    # mask_ref: (TB, 1[, 1]) float32 VMEM tile, broadcasts against x tile.
    # x_ref / o_ref: (TB, TS, 128) or (TB, TL) VMEM tiles.
    o_ref[...] = (x_ref[...].astype(jnp.float32) * mask_ref[...]).astype(o_ref.dtype)


def _drop_path_residual_kernel(mask_ref, x_ref, res_ref, o_ref):
    # Fused `shortcut + drop_path(x)` (Swin residual pattern): one pass over HBM.
    o_ref[...] = (res_ref[...].astype(jnp.float32)
                  + x_ref[...].astype(jnp.float32) * mask_ref[...]).astype(o_ref.dtype)


# ---------------------------------------------------------------------------
# Layout / tiling helpers
# ---------------------------------------------------------------------------

def _sublane(dtype):
    itemsize = jnp.dtype(dtype).itemsize
    return max(8, 32 // itemsize)          # 8 for f32, 16 for bf16, 32 for int8


def _default_block_bytes():
    # v7x: 64 MiB physical VMEM but ~3.2 TB/s HBM -> 4 MiB tiles amortize the
    # fixed per-grid-step cost; 2 MiB is already ~85%+ of roofline on v5e/v6e.
    try:
        info = pltpu.get_tpu_info()
        vmem = getattr(info, "vmem_capacity_bytes", None)
        if vmem is not None and vmem <= (64 << 20):
            return 4 << 20
    except Exception:
        pass
    return 2 << 20


def _choose_tiling(shape, dtype, block_bytes):
    """Pick a flattened view of x and its tile.

    Returns (mode, view_shape, block_shape, grid):
      mode "3d": lane-dense view (B, S, 128), block (TB, TS, 128)
      mode "2d": fallback view (B, total), block (TB, TL) with TL a multiple
                 of 128 (only the tail tile per row needs masked stores).
    """
    B = int(shape[0])
    total = int(math.prod(shape[1:])) if len(shape) > 1 else 1
    total = max(total, 1)
    itemsize = jnp.dtype(dtype).itemsize
    sub = _sublane(dtype)

    if total % 128 == 0:
        lanes, S = 128, total // 128
        per_sample = S * lanes * itemsize
        if per_sample >= block_bytes:
            TB = 1
            rows = max(sub, block_bytes // (lanes * itemsize))
            TS = S if rows >= S else max(sub, (rows // sub) * sub)
        else:
            # Batch several samples into one tile to restore MiB-sized DMAs.
            TS = S
            TB = min(B, max(1, block_bytes // per_sample))
        # v7x megacore: avoid a degenerate (1, 1) grid when there is work to split.
        if pl.cdiv(B, TB) * pl.cdiv(S, TS) < 2:
            if B >= 2:
                TB = -(-B // 2)
            elif S >= 2 * sub:
                TS = max(sub, ((S // 2) // sub) * sub)
        grid = (pl.cdiv(B, TB), pl.cdiv(S, TS))
        return "3d", (B, S, lanes), (TB, TS, lanes), grid

    # ---- fallback: total % 128 != 0 -> (B, total), 128-multiple column tiles
    per_sample = total * itemsize
    if per_sample >= block_bytes:
        TB = min(B, 8)                                   # sublane-legal row tile
    else:
        tb = max(1, block_bytes // per_sample)
        TB = B if (tb >= B or B <= 8) else max(8, (tb // 8) * 8)
    target_cols = max(128, block_bytes // max(1, TB * itemsize))
    if total <= 128 or target_cols >= total:
        TL = total                                       # full last dim (always legal)
    else:
        TL = max(128, (target_cols // 128) * 128)        # lane-dense; masked tail only
    # v7x megacore: prefer >= 2 grid steps when the column axis allows it.
    if pl.cdiv(B, TB) * pl.cdiv(total, TL) < 2 and total >= 256:
        TL = max(128, 128 * ((total // 2) // 128))
    grid = (pl.cdiv(B, TB), pl.cdiv(total, TL))
    return "2d", (B, total), (TB, TL), grid


# ---------------------------------------------------------------------------
# Wrapper
# ---------------------------------------------------------------------------

def drop_path(x, drop_prob: float = 0.0, training: bool = False, *,
              key=None, residual=None, block_bytes=None):
    """Pallas DropPath (stochastic depth); matches drop_path_f semantics.

    If `residual` is provided, returns `residual + drop_path(x)` fused into a
    single pass over the activation tensor.
    """
    if drop_prob == 0.0 or not training:
        return x if residual is None else residual + x
    assert key is not None, "need a PRNG key when training with drop_prob > 0"
    if residual is not None:
        assert residual.shape == x.shape and residual.dtype == x.dtype

    keep_prob = 1.0 - float(drop_prob)
    B = x.shape[0]
    if block_bytes is None:
        block_bytes = _default_block_bytes()

    # Per-sample Bernoulli(keep_prob) / keep_prob, computed and kept in float32
    # (the product is cast to x.dtype inside the kernel).
    u = jax.random.uniform(key, (B,), dtype=jnp.float32)
    mask = jnp.floor(keep_prob + u) / jnp.float32(keep_prob)             # (B,) f32

    mode, vshape, blk, grid = _choose_tiling(x.shape, x.dtype, block_bytes)
    x2 = x.reshape(vshape)
    if mode == "3d":
        mask_v = mask.reshape(B, 1, 1)
        mask_spec = pl.BlockSpec((blk[0], 1, 1), lambda b, s: (b, 0, 0))
        data_spec = pl.BlockSpec(blk, lambda b, s: (b, s, 0))
        tile_elems = blk[0] * blk[1] * blk[2]
    else:
        mask_v = mask.reshape(B, 1)
        mask_spec = pl.BlockSpec((blk[0], 1), lambda b, s: (b, 0))
        data_spec = pl.BlockSpec(blk, lambda b, s: (b, s))
        tile_elems = blk[0] * blk[1]
    tile_bytes = tile_elems * jnp.dtype(x.dtype).itemsize

    if residual is None:
        kernel, in_specs, operands, n_big = (
            _drop_path_kernel, [mask_spec, data_spec], (mask_v, x2), 2)
    else:
        kernel, in_specs, operands, n_big = (
            _drop_path_residual_kernel, [mask_spec, data_spec, data_spec],
            (mask_v, x2, residual.reshape(vshape)), 3)

    # Scoped-VMEM cap sized to the actual double-buffered footprint (+ slack)
    # so identical tiling compiles on v5e (16 MiB default), v6e and v7x.
    footprint = 2 * n_big * tile_bytes + (1 << 20)
    vmem_limit = int(min(max(footprint + (2 << 20), 16 << 20), 64 << 20))

    out2 = pl.pallas_call(
        kernel,
        out_shape=jax.ShapeDtypeStruct(vshape, x.dtype),
        grid_spec=pltpu.PrefetchScalarGridSpec(
            num_scalar_prefetch=0,
            grid=grid,
            in_specs=in_specs,
            out_specs=data_spec,
        ),
        compiler_params=pltpu.CompilerParams(
            dimension_semantics=("parallel", "parallel"),
            vmem_limit_bytes=vmem_limit),
    )(*operands)
    return out2.reshape(x.shape)
    # TODO(synk): optional drop_prob-fraction read skip (pl.ANY + manual DMA under
    # pl.when(mask != 0)) not implemented; auto-pipelined path kept for simplicity.


class DropPath:
    """Mirror of the PyTorch DropPath module (no parameters)."""

    def __init__(self, drop_prob=None):
        self.drop_prob = 0.0 if drop_prob is None else float(drop_prob)
        self.training = True

    def __call__(self, x, *, key=None, residual=None):
        return drop_path(x, self.drop_prob, self.training,
                         key=key, residual=residual)


# ---------------------------------------------------------------------------
# Self-test
# ---------------------------------------------------------------------------

if __name__ == "__main__":
    root = jax.random.PRNGKey(0)
    k_x, k_m, k_r = jax.random.split(root, 3)

    def ref_drop_path(x, p, key):
        kp = 1.0 - p
        u = jax.random.uniform(key, (x.shape[0],), dtype=jnp.float32)
        m = jnp.floor(kp + u) / kp
        scaled = x.astype(jnp.float32) * m.reshape((-1,) + (1,) * (x.ndim - 1))
        return scaled.astype(x.dtype)

    # 1) f32 Swin-like tokens (B, L, C) with C=96 -> lane-dense (B, S, 128) path
    B, L, C = 2, 64, 96
    x = jax.random.normal(k_x, (B, L, C), dtype=jnp.float32)
    layer = DropPath(drop_prob=0.25)
    layer.training = True
    out = jax.block_until_ready(layer(x, key=k_m))
    ref = ref_drop_path(x, 0.25, k_m)
    assert out.shape == x.shape
    assert jnp.allclose(out, ref, atol=1e-6), "f32 mismatch vs reference"

    # 2) forced multi-tile grid with a partial boundary row tile (f32)
    x2 = jax.random.normal(k_x, (2, 80, 128), dtype=jnp.float32)
    out2 = jax.block_until_ready(
        drop_path(x2, 0.25, True, key=k_m, block_bytes=16 << 10))
    assert jnp.allclose(out2, ref_drop_path(x2, 0.25, k_m), atol=1e-6), \
        "tiled f32 mismatch vs reference"

    # 3) bf16 input (f32 multiply, cast once), small tiles
    xb = x.astype(jnp.bfloat16)
    outb = jax.block_until_ready(
        drop_path(xb, 0.25, True, key=k_m, block_bytes=4 << 10))
    refb = ref_drop_path(xb, 0.25, k_m)
    assert jnp.allclose(outb.astype(jnp.float32), refb.astype(jnp.float32),
                        atol=1e-2, rtol=1e-2), "bf16 mismatch vs reference"

    # 4) fused residual add: shortcut + drop_path(x)
    shortcut = jax.random.normal(k_r, (B, L, C), dtype=jnp.float32)
    out_res = jax.block_until_ready(
        drop_path(x, 0.25, True, key=k_m, residual=shortcut))
    assert jnp.allclose(out_res, shortcut + ref, atol=1e-6), \
        "fused residual mismatch vs reference"

    # 5) sample batching: many small samples packed into one tile (B tiled)
    xs = jax.random.normal(k_x, (16, 64, 32), dtype=jnp.float32)
    ks = jax.random.fold_in(k_m, 5)
    outs = jax.block_until_ready(drop_path(xs, 0.25, True, key=ks))
    assert jnp.allclose(outs, ref_drop_path(xs, 0.25, ks), atol=1e-6), \
        "sample-batched mismatch vs reference"

    # 6) non-128-multiple fallback, single tile per row (total < 256)
    xf = jax.random.normal(k_x, (2, 5, 49), dtype=jnp.float32)
    outf = jax.block_until_ready(drop_path(xf, 0.25, True, key=k_m))
    assert jnp.allclose(outf, ref_drop_path(xf, 0.25, k_m), atol=1e-6), \
        "fallback (small) mismatch vs reference"

    # 7) non-128-multiple fallback with 128-wide column tiles + masked tail
    xg = jax.random.normal(k_x, (2, 3, 100), dtype=jnp.float32)
    outg = jax.block_until_ready(
        drop_path(xg, 0.25, True, key=k_m, block_bytes=1 << 10))
    assert jnp.allclose(outg, ref_drop_path(xg, 0.25, k_m), atol=1e-6), \
        "fallback (tiled) mismatch vs reference"

    # 8) identity paths: eval mode / drop_prob == 0
    layer.training = False
    assert jnp.array_equal(jax.block_until_ready(layer(x, key=k_m)), x)
    assert jnp.array_equal(drop_path(x, 0.0, True, key=k_m), x)

    print("KERNEL_OK")
</pallas_src>

<mosaic_0001>
module attributes {stable_mosaic.version = 11 : i64} {
  func.func @_drop_path_kernel(%arg0: i32, %arg1: i32, %arg2: memref<1x1x1xf32, #tpu.memory_space<vmem>>, %arg3: memref<1x48x128xf32, #tpu.memory_space<vmem>>, %arg4: memref<1x48x128xf32, #tpu.memory_space<vmem>>) attributes {dimension_semantics = [#tpu.dimension_semantics<parallel>, #tpu.dimension_semantics<parallel>], iteration_bounds = array<i64: 2, 1>, scalar_prefetch = 0 : i64, scratch_operands = 0 : i64, tpu.core_type = #tpu.core_type<tc>, window_params = [{transform_indices = @transform_0, window_bounds = array<i64: 1, 1, 1>}, {transform_indices = @transform_1, window_bounds = array<i64: 1, 48, 128>}, {transform_indices = @transform_2, window_bounds = array<i64: 1, 48, 128>}]} {
    %c0 = arith.constant 0 : index
    %c0_0 = arith.constant 0 : index
    %c0_1 = arith.constant 0 : index
    %0 = vector.load %arg3[%c0, %c0_0, %c0_1] : memref<1x48x128xf32, #tpu.memory_space<vmem>>, vector<1x48x128xf32>
    %c0_2 = arith.constant 0 : index
    %c0_3 = arith.constant 0 : index
    %c0_4 = arith.constant 0 : index
    %1 = vector.load %arg2[%c0_2, %c0_3, %c0_4] : memref<1x1x1xf32, #tpu.memory_space<vmem>>, vector<1x1x1xf32>
    %2 = vector.broadcast %1 : vector<1x1x1xf32> to vector<1x48x128xf32>
    %3 = arith.mulf %0, %2 : vector<1x48x128xf32>
    %c0_5 = arith.constant 0 : index
    %c0_6 = arith.constant 0 : index
    %c0_7 = arith.constant 0 : index
    %4 = vector.load %arg4[%c0_5, %c0_6, %c0_7] : memref<1x48x128xf32, #tpu.memory_space<vmem>>, vector<1x48x128xf32>
    tpu.vector_store %arg4[%c0_5, %c0_6, %c0_7], %3 {strides = array<i32>} : memref<1x48x128xf32, #tpu.memory_space<vmem>>, vector<1x48x128xf32>,
    return
  }
  func.func @transform_0(%arg0: i32, %arg1: i32) -> (i32, i32, i32) {
    %c0_i32 = arith.constant 0 : i32
    %c0_i32_0 = arith.constant 0 : i32
    %c0_i32_1 = arith.constant 0 : i32
    return %arg0, %c0_i32, %c0_i32_0 : i32, i32, i32
  }
  func.func @transform_1(%arg0: i32, %arg1: i32) -> (i32, i32, i32) {
    %c0_i32 = arith.constant 0 : i32
    %c0_i32_0 = arith.constant 0 : i32
    return %arg0, %arg1, %c0_i32 : i32, i32, i32
  }
  func.func @transform_2(%arg0: i32, %arg1: i32) -> (i32, i32, i32) {
    %c0_i32 = arith.constant 0 : i32
    %c0_i32_0 = arith.constant 0 : i32
    return %arg0, %arg1, %c0_i32 : i32, i32, i32
  }
}

</mosaic_0001>

<bundles_post_ra>
// kernel: tpu_custom_call.1
= control target key start
LH: loop header
LB: loop body
LE: loop exit
PB: predicated region body
PF: predicated region fallthrough
CT: control target
= control target key end

     0   :  { %7 = vsyncpa [#allocation3], 0  ;;  %s734_s0 = inlined_call_operand.vmem [shape: f32[2,1,1], index: 0, kind: input, shape index: {}]   ;;  %s735_s1 = inlined_call_operand.hbm [shape: f32[2,48,128], index: 1, kind: input, shape index: {}]   ;;  %s736_s2 = inlined_call_operand.hbm [shape: f32[2,48,128], index: 2, kind: output, shape index: {}]  }
   0x1   :  { %9 = vsyncpa [#allocation3 + $0x1], 0 }
   0x2   :  { %10 = vsyncpa [#allocation4], 0 }
   0x3   :  { %12 = vsyncpa [#allocation4 + $0x1], 0  ;;  %s554_s9 = smov 0   ;;  %s556_s10 = smov 0  }
   0x4   :  { %s558_s11 = smov 0   ;;  %s560_s12 = smov 0  }
   0x5   :  { %s562_s13 = smov 0   ;;  %s564_s14 = smov 0  }
   0x6 LB: > { %s336_s15 = sadd.s32 4294967295, %s530_s14   ;;  %s337_s16 = sadd.s32 4294967294, %s530_s14   ;;  %s530_s14 = sphi %s564_s14, %s18_s14   ;;  %s526_s13 = sphi %s562_s13, %s751_s13   ;;  %s522_s12 = sphi %s560_s12, %s750_s12   ;;  %s518_s11 = sphi %s558_s11, %s749_s11   ;;  %s514_s10 = sphi %s556_s10, %s748_s10   ;;  %s510_s9 = sphi %s554_s9, %s747_s9  }
   0x7   : > { %s30_s17 = sadd.s32 1, %s526_s13  ;;  %s65_s18 = sadd.s32 1, %s518_s11 }
   0x8   : > { %p32_p0 = scmp.ge.s32.totalorder %s30_s17, 2  ;;  %p72_p1 = scmp.ne.s32.totalorder %s518_s11, %s514_s10 }
   0x9   : > { %p73_p2 = scmp.eq.s32.totalorder %s530_s14, 0  ;;  %p78_p3 = scmp.ne.s32.totalorder %s514_s10, %s510_s9 }
   0xa   : > { %s753_s17 = smov (%p32_p0, %s30_s17), 0  ;;  %p79_p5 = scmp.eq.s32.totalorder %s336_s15, 0 }
   0xb   : > { %p595_p4 = por %p73_p2, %p72_p1  ;;  %s60_s20 = ssub.s32 %s526_s13, %s753_s17 }
   0xc   : > { %p104_p6 = scmp.eq.s32.totalorder %s336_s15, 1  ;;  %p63_p7 = scmp.eq.s32.totalorder %s60_s20, 0 }
   0xd   : > { %p601_p8 = por %p79_p5, %p78_p3  ;;  %p110_p10 = scmp.eq.s32.totalorder %s337_s16, 1 }
   0xe   : > { %p605_p9 = por %p104_p6, %p72_p1  ;;  %p362_p13 = scmp.lt.s32.totalorder %s530_s14, 2 }
   0xf   : > { %s610_s23 = scalar_select %p63_p7, %s518_s11, %s65_s18  }
  0x10   : > { %s740_s22 = scalar_select %p605_p9, 1, 0 }
  0x11   : > { %p612_p11 = por %p110_p10, %p78_p3  ;;  %s136_s25 = sand.u32 1, %s518_s11  }
  0x12   : > { %s346_s26 = smul.u32 48, %s136_s25  ;;  %p622_p0 = pnand %p362_p13, %p595_p4 }
  0x13   : > { %s741_s24 = scalar_select %p612_p11, 1, 0 }
  0x14   : > { %s347_s27 = smul.u32 768, %s526_s13  ;;  %s140_s4 = scalar_lea.vmem [#allocation2], %s346_s26 }
  0x15   : > { %s149_s5 = sshll.u32 %s140_s4, 4  ;;  %s634_s6 = scalar_lea.sflag [#allocation3], %s136_s25  ;;  %s631_s5 = int_to_ptr.vmem [resolvable:$true] %s149_s5 }
  0x16   : > { %s629_s3 = scalar_lea.hbm %s735_s1, %s347_s27  ;;  %p420_p3 = pneg %p622_p0 }
  0x17   : > { %s418_s7 = scalar_lea.hbm %s629_s3, 768  ;;  %s423_s16 = scalar_lea.hbm %s735_s1, 1536 }
  0x18   : > { %p419_p2 = scmp.ne.s32.totalorder %s629_s3, %s418_s7  ;;  %p424_p6 = scmp.lt.u32.totalorder %s629_s3, %s735_s1 }
  0x19   : > { %p425_p7 = scmp.lt.u32.totalorder %s423_s16, %s418_s7  ;;  %p427_p13 = scmp.lt.u32.totalorder %s418_s7, %s629_s3 }
  0x1a   : > { %p421_p4 = pnand %p420_p3, %p419_p2 }
  0x1b   : > { %p426_p10 = por %p425_p7, %p424_p6 }
  0x1c   : > { %p422_p5 = pneg %p421_p4 }
  0x1d   : > { %p428_p12 = por %p427_p13, %p426_p10 }
  0x1f   : > { %p429_p1 = pnand %p428_p12, %p422_p5 }
  0x21   : > { %432 = shalt.err (!%p429_p1)
}
  0x22   : > { %s433_s20 = scalar_lea.vmem %s631_s5, 768  ;;  %s532_s25 = smov [#allocation2]  }
  0x23   : > { %p434_p2 = scmp.ne.s32.totalorder %s631_s5, %s433_s20  ;;  %s438_s26 = sshll.u32 %s532_s25, 4  ;;  %s439_s26 = int_to_ptr.vmem [resolvable:$false] %s438_s26 }
  0x24   : > { %s440_s27 = scalar_lea.vmem %s439_s26, 1536  ;;  %p441_p9 = scmp.lt.s32.totalorder %s631_s5, %s439_s26 }
  0x25   : > { %p436_p4 = pnand %p434_p2, %p420_p3  ;;  %p442_p6 = scmp.lt.s32.totalorder %s440_s27, %s433_s20 }
  0x27   : > { %p437_p11 = pneg %p436_p4  ;;  %p443_p7 = por %p442_p6, %p441_p9 }
  0x29   : > { %p444_p10 = pnand %p443_p7, %p437_p11 }
  0x2b   : > { %447 = shalt.err (!%p444_p10)
}
  0x2c   : > { %s533_s29 = smov 128   ;;  %s534_s30 = smov 8  }
  0x2d   : > { %357 = dma.hbm_to_vmem [thread:$0]  (!%p622_p0), %s629_s3, 768, %s631_s5, %s634_s6, %s533_s29, %s533_s29, %s534_s30  }
  0x2e   : > { %p157_p12 = scmp.lt.s32.totalorder %s530_s14, 3  ;;  %p743_p1 = scmp.ge.s32.totalorder %s530_s14, 1 }
  0x30   : > { %p158_p3 = pnand %p743_p1, %p157_p12 }
  0x31   : > { %s666_s4 = sand.u32 (!%p158_p3), 1, %s514_s10  }
  0x32   : > { %161 = sbr.rel (%p158_p3) target bundleno = 211 (0xd3), region = 28  ;;  %s164_s8 = scalar_lea.sflag (!%p158_p3), [#allocation3], %s666_s4 }
  0x33   : > { %s348_s7 = smul.u32 (!%p158_p3), 48, %s666_s4 }
  0x35   : > { %s167_s15 = scalar_lea.vmem (!%p158_p3), [#allocation2], %s348_s7 }
  0x39   : > { %501 = dma.done.wait (%p601_p8), %s164_s8, 768  }
  0x3a   : > { %503 = vsyncadd (%p601_p8), %s164_s8, 4294966528  ;;  %p191_p9 = scmp.lt.s32.totalorder %s522_s12, 1  ;;  %v535_v0 = vmov 0   ;;  %v196_v2 = vld [vmem:[%s167_s15] sm:$0xff]  ;;  %s349_s16 = smul.u32 768, %s522_s12  ;;  %v197_v3 = vld [vmem:[%s167_s15 + $0x8] sm:$0xff] }
  0x3b   : > { %417 = vset.pattern.permute.xlu0 %v535_v0  ;;  %v198_v4 = vld [vmem:[%s167_s15 + $0x10] sm:$0xff]  ;;  %v199_v5 = vld [vmem:[%s167_s15 + $0x18] sm:$0xff]  ;;  %s190_s21 = scalar_lea.vmem [#allocation5], %s348_s7  ;;  %v200_v6 = vld [vmem:[%s167_s15 + $0x20] sm:$0xff]  ;;  %p744_p11 = scmp.ne.s32.totalorder %s740_s22, 0 }
  0x3c   : > { %s192_s28 = scalar_select %p191_p9, %s522_s12, 1  ;;  %v201_v7 = vld [vmem:[%s167_s15 + $0x28] sm:$0xff] }
  0x3d   : > { %s240_s18 = sshll.u32 %s190_s21, 4  ;;  %s683_s25 = scalar_lea.hbm %s736_s2, %s349_s16  ;;  %s685_s18 = int_to_ptr.vmem [resolvable:$true] %s240_s18 }
  0x3e   : > { %s193_s6 = scalar_lea.vmem %s734_s0, %s192_s28  ;;  %s225_s12 = scalar_lea.sflag [#allocation4], %s666_s4 }
  0x3f   : > { %v342_v1 = vld [vmem:[%s193_s6] ss:$0 sm:$0xff]  ;;  %s448_s26 = scalar_lea.vmem %s685_s18, 768  ;;  %s536_s27 = smov [#allocation5]  }
  0x40   : > { %209 = vperm.xlu0 %417, %v342_v1   ;;  %p449_p8 = scmp.ne.s32.totalorder %s685_s18, %s448_s26  ;;  %s452_s29 = sshll.u32 %s536_s27, 4  ;;  %s453_s29 = int_to_ptr.vmem [resolvable:$false] %s452_s29 }
  0x41   : > { %s454_s30 = scalar_lea.vmem %s453_s29, 1536  ;;  %p455_p13 = scmp.lt.s32.totalorder %s685_s18, %s453_s29 }
  0x42   : > { %p450_p0 = pnand %p449_p8, %p744_p11  ;;  %p456_p2 = scmp.lt.s32.totalorder %s454_s30, %s448_s26 }
  0x44   : > { %p451_p5 = pneg %p450_p0  ;;  %p457_p4 = por %p456_p2, %p455_p13 }
  0x46   : > { %p458_p6 = pnand %p457_p4, %p451_p5 }
  0xbf   : > { %v210_v8 = vpop.permute.xlu0 %209 }
  0xc0   : > { %v212_v9 = vmul.f32 %v210_v8, %v196_v2  ;;  %v213_v10 = vmul.f32 %v210_v8, %v197_v3  ;;  %v214_v11 = vmul.f32 %v210_v8, %v198_v4  ;;  %v215_v12 = vmul.f32 %v210_v8, %v199_v5 }
  0xc1   : > { %v216_v13 = vmul.f32 %v210_v8, %v200_v6  ;;  %v217_v14 = vmul.f32 %v210_v8, %v201_v7 }
  0xc2   : > { %218 = vst [vmem:[%s190_s21] sm:$0xff] %v212_v9  ;;  %219 = vst [vmem:[%s190_s21 + $0x8] sm:$0xff] %v213_v10 }
  0xc3   : > { %220 = vst [vmem:[%s190_s21 + $0x10] sm:$0xff] %v214_v11  ;;  %221 = vst [vmem:[%s190_s21 + $0x18] sm:$0xff] %v215_v12 }
  0xc4   : > { %222 = vst [vmem:[%s190_s21 + $0x20] sm:$0xff] %v216_v13  ;;  %223 = vst [vmem:[%s190_s21 + $0x28] sm:$0xff] %v217_v14 }
  0xc5   : > { %461 = shalt.err (!%p458_p6)
}
  0xc6   : > { %s462_s7 = scalar_lea.hbm %s683_s25, 768  ;;  %s466_s28 = scalar_lea.hbm %s736_s2, 1536 }
  0xc7   : > { %p463_p7 = scmp.ne.s32.totalorder %s683_s25, %s462_s7  ;;  %p467_p1 = scmp.lt.u32.totalorder %s683_s25, %s736_s2 }
  0xc8   : > { %p468_p3 = scmp.lt.u32.totalorder %s466_s28, %s462_s7  ;;  %p470_p8 = scmp.lt.u32.totalorder %s462_s7, %s683_s25 }
  0xc9   : > { %p464_p10 = pnand %p463_p7, %p744_p11 }
  0xca   : > { %p469_p9 = por %p468_p3, %p467_p1 }
  0xcb   : > { %p465_p12 = pneg %p464_p10 }
  0xcc   : > { %p471_p0 = por %p470_p8, %p469_p9 }
  0xce   : > { %p472_p5 = pnand %p471_p0, %p465_p12 }
  0xd0   : > { %475 = shalt.err (!%p472_p5)
}
  0xd1   : > { %s537_s6 = smov 128   ;;  %s538_s16 = smov 8  }
  0xd2   : > { %352 = dma.vmem_to_hbm [thread:$0]  (%p744_p11), %s685_s18, 768, %s683_s25, %s225_s12, %s537_s6, %s537_s6, %s538_s16  }
  0xd3 PF: > { %s255_s21 = sand.u32 1, %s510_s9   ;;  %p745_p13 = scmp.ne.s32.totalorder %s741_s24, 0 }
  0xd4   : > { %p746_p2 = scmp.ge.s32.totalorder %s530_s14, 2  ;;  %s256_s19 = scalar_lea.sflag [#allocation4], %s255_s21 }
  0xd6   : > { %p359_p4 = pnand %p746_p2, %p745_p13 }
  0xd8   : > { %505 = dma.done.wait (!%p359_p4), %s256_s19, 768  }
  0xd9   : > { %507 = vsyncadd (!%p359_p4), %s256_s19, 4294966528  ;;  %s18_s14 = sadd.s32 1, %s530_s14   ;;  %s747_s9 = smov %s514_s10 }
  0xda   : > { %p15_p6 = scmp.ge.s32.totalorder %s18_s14, 4   ;;  %s748_s10 = smov %s518_s11 }
  0xdb   : > { %s749_s11 = smov %s610_s23  ;;  %s750_s12 = smov %s526_s13 }
  0xdc   : > { %s751_s13 = smov %s753_s17  ;;  %17 = sbr.rel (!%p15_p6) target bundleno = 6 (0x6), region = 76 }
  0xe3   :  { %261 = vsyncpa [#allocation3], 1 }
  0xe4   :  { %263 = vsyncpa [#allocation3 + $0x1], 1 }
  0xe5   :  { %264 = vsyncpa [#allocation4], 1 }
  0xe6   :  { %266 = vsyncpa [#allocation4 + $0x1], 1 }

</bundles_post_ra>
